<compile_context>
chip_gen: v5e
topology: v5e:2x2
jax: 0.10.0
libtpu: 0.0.40
codegen_flags: <defaults>
</compile_context>

<pallas_src>
import functools

import jax
import jax.numpy as jnp
from jax.experimental import pallas as pl
from jax.experimental.pallas import tpu as pltpu


def _round_up(x, m):
    return (x + m - 1) // m * m


def _cdiv(a, b):
    return -(-a // b)


def _vmem_capacity_bytes():
    try:
        return int(pltpu.get_tpu_info().vmem_capacity_bytes)
    except Exception:
        return 64 << 20  # conservative: v7x per-TensorCore VMEM


def _choose_batch_tile(B, C, tb):
    """Pick the batch-tile row count: balanced tiles, bf16-sublane aligned."""
    if tb is None:
        # Small C is overhead / HBM-bound: amortize the ~0.35us per-step cost
        # with large tiles; shrink the budget as the weights/intermediates grow.
        tb = 2048 if C <= 512 else (1024 if C <= 1024 else 512)
    n_tiles = max(1, _cdiv(B, tb))
    if n_tiles == 1 and B >= 512:
        n_tiles = 2  # give v7x's second TensorCore work on mid-size batches
    TB = _round_up(_cdiv(B, n_tiles), 16)  # bf16 packs 16 sublanes per vreg
    # Promote to the MXU-native 256 multiple only if the extra padding is small.
    cand = _round_up(TB, 256)
    if _round_up(B, cand) <= _round_up(B, TB) + max(B // 8, 16):
        TB = cand
    return TB


def mlp_ffn_neck_kernel(x_ref,
                        w1_ref, c1_ref,
                        w2_ref, c2_ref,
                        w3_ref, b3_ref,
                        o_ref):
    # Compute on the MXU in bf16 with f32 accumulation.
    x = x_ref[...].astype(w1_ref.dtype)                                # (TB, C) bf16

    # ln1: Linear (BN scale folded into W) -> +shift -> ReLU
    h1 = jnp.dot(x, w1_ref[...], preferred_element_type=jnp.float32)   # (TB, H) f32
    h1 = jnp.maximum(h1 + c1_ref[...], 0.0)
    h1 = h1.astype(w2_ref.dtype)                                       # bf16

    # ln2: Linear (BN scale folded into W) -> +shift -> ReLU
    h2 = jnp.dot(h1, w2_ref[...], preferred_element_type=jnp.float32)
    h2 = jnp.maximum(h2 + c2_ref[...], 0.0)
    h2 = h2.astype(w3_ref.dtype)                                       # bf16

    # ln3: Linear + bias
    out = jnp.dot(h2, w3_ref[...], preferred_element_type=jnp.float32)
    out = out + b3_ref[...]

    o_ref[...] = out.astype(o_ref.dtype)


@functools.partial(jax.jit, static_argnames=("tb", "out_dtype"))
def mlp_ffn_neck(x, params, *, tb=None, out_dtype=jnp.bfloat16):
    (w1, c1, w2, c2, w3, b3) = params
    B, C = x.shape
    H = w1.shape[1]

    TB = _choose_batch_tile(B, C, tb)
    Bp = _round_up(B, TB)
    if Bp != B:
        # Padding is small by construction (balanced tiles); padded rows produce
        # garbage that is discarded by the final slice.
        x = jnp.pad(x, ((0, Bp - B), (0, 0)))
    grid = (Bp // TB,)

    x_bytes = x.dtype.itemsize
    o_bytes = jnp.dtype(out_dtype).itemsize
    w_itemsize = w1.dtype.itemsize

    # VMEM budget: weights single-buffered; (1,H) f32 shifts pad to 8 sublanes;
    # x/out tiles double-buffered; h1/h2 materialize as f32 + bf16 copies.
    w_bytes = (C * H + 2 * H * H) * w_itemsize
    s_bytes = 3 * 8 * H * 4
    act_bytes = 2 * TB * (C * x_bytes + H * o_bytes)
    mid_bytes = 2 * TB * H * (4 + 2)
    need = w_bytes + s_bytes + act_bytes + mid_bytes + (4 << 20)

    vmem_cap = _vmem_capacity_bytes()
    vmem_limit = int(min(max(need, 32 << 20), (vmem_cap * 7) // 8))
    if w_bytes > vmem_limit // 2:
        # TODO(synk): add an N-tiled (output-column) weight path for very large C.
        raise ValueError(
            f"resident weights ({w_bytes >> 20} MiB) exceed half the VMEM budget "
            f"({vmem_limit >> 20} MiB); in_channels too large for this kernel")

    cost = pl.CostEstimate(
        flops=2 * Bp * (C * H + 2 * H * H),
        transcendentals=0,
        bytes_accessed=(C * H + 2 * H * H) * w_itemsize + 3 * H * 4
                       + Bp * C * x_bytes + Bp * H * o_bytes,
    )

    # Weights / shifts: constant index_map -> fetched once; single-buffered so
    # they don't waste VMEM on a second (never-used) pipeline buffer.
    resident = lambda shape: pl.BlockSpec(
        shape, lambda i: (0, 0), pipeline_mode=pl.Buffered(1))

    out = pl.pallas_call(
        mlp_ffn_neck_kernel,
        out_shape=jax.ShapeDtypeStruct((Bp, H), out_dtype),
        grid=grid,
        in_specs=[
            pl.BlockSpec((TB, C), lambda i: (i, 0)),   # x tile (double-buffered)
            resident((C, H)), resident((1, H)),        # w1 (BN scale folded), c1
            resident((H, H)), resident((1, H)),        # w2, c2
            resident((H, H)), resident((1, H)),        # w3, b3
        ],
        out_specs=pl.BlockSpec((TB, H), lambda i: (i, 0)),
        compiler_params=pltpu.CompilerParams(
            dimension_semantics=("parallel",),
            vmem_limit_bytes=vmem_limit,
        ),
        cost_estimate=cost,
    )(x, w1, c1, w2, c2, w3, b3)

    return out[:B] if Bp != B else out


def make_params(key, in_channels):
    """Deterministic synthetic parameters matching MLPFFNNeck's shapes."""
    H = in_channels * 2
    eps = 1e-5
    ks = jax.random.split(key, 6)

    # Linear weights (PyTorch stores (out, in); we pre-transpose to (in, out)).
    w1 = jax.random.normal(ks[0], (in_channels, H), jnp.float32) * 0.05
    b1 = jax.random.normal(ks[1], (H,), jnp.float32) * 0.05
    w2 = jax.random.normal(ks[2], (H, H), jnp.float32) * 0.05
    b2 = jax.random.normal(ks[3], (H,), jnp.float32) * 0.05
    w3 = jax.random.normal(ks[4], (H, H), jnp.float32) * 0.05
    b3 = jax.random.normal(ks[5], (H,), jnp.float32) * 0.05

    # BatchNorm1d default params (eval mode): gamma=1, beta=0, mean=0, var=1.
    gamma1 = jnp.ones((H,), jnp.float32)
    beta1 = jnp.zeros((H,), jnp.float32)
    mean1 = jnp.zeros((H,), jnp.float32)
    var1 = jnp.ones((H,), jnp.float32)
    gamma2, beta2, mean2, var2 = gamma1, beta1, mean1, var1

    # Fold BN into the layer:  BN(xW + b) = x(W*s) + ((b - mean)*s + beta)
    # with s = gamma / sqrt(var + eps).  Scale goes into the weight columns;
    # the shift stays as an f32 per-channel add in the kernel.
    s1 = gamma1 / jnp.sqrt(var1 + eps)
    c1 = (b1 - mean1) * s1 + beta1
    s2 = gamma2 / jnp.sqrt(var2 + eps)
    c2 = (b2 - mean2) * s2 + beta2

    w1f = (w1 * s1[None, :]).astype(jnp.bfloat16)
    w2f = (w2 * s2[None, :]).astype(jnp.bfloat16)
    w3f = w3.astype(jnp.bfloat16)

    # Shifts/bias as (1, H) f32 for lane-major broadcast in the kernel.
    return (w1f, c1[None, :], w2f, c2[None, :], w3f, b3[None, :])


def reference(x, params):
    """Pure-JAX reference mirroring the kernel's bf16/f32 mixed precision."""
    (w1, c1, w2, c2, w3, b3) = params
    xb = x.astype(jnp.bfloat16)
    h1 = jnp.maximum(jnp.dot(xb, w1, preferred_element_type=jnp.float32) + c1, 0.0)
    h1 = h1.astype(jnp.bfloat16)
    h2 = jnp.maximum(jnp.dot(h1, w2, preferred_element_type=jnp.float32) + c2, 0.0)
    h2 = h2.astype(jnp.bfloat16)
    return jnp.dot(h2, w3, preferred_element_type=jnp.float32) + b3


if __name__ == "__main__":
    C = 128          # in_channels (small, lane-aligned); H = 2C = 256
    key = jax.random.PRNGKey(0)
    kx, kp = jax.random.split(key)
    params = make_params(kp, C)

    def check(B):
        x = jax.random.normal(kx, (B, C), jnp.float32)
        out = jax.block_until_ready(mlp_ffn_neck(x, params))
        ref = reference(x, params)
        assert out.shape == (B, 2 * C), out.shape
        assert out.dtype == jnp.bfloat16, out.dtype
        err = jnp.max(jnp.abs(out.astype(jnp.float32) - ref))
        # bf16 output quantization dominates the tolerance.
        assert err < 2e-2, float(err)

    check(8)      # tiny batch (single padded tile)
    check(520)    # multi-tile + padded batch (exercises the "parallel" grid axis)

    print("KERNEL_OK")
</pallas_src>

<mosaic_0001>
module attributes {stable_mosaic.version = 11 : i64} {
  func.func @mlp_ffn_neck_kernel(%arg0: i32, %arg1: memref<16x128xf32, #tpu.memory_space<vmem>>, %arg2: memref<128x256xbf16, #tpu.memory_space<vmem>>, %arg3: memref<1x256xf32, #tpu.memory_space<vmem>>, %arg4: memref<256x256xbf16, #tpu.memory_space<vmem>>, %arg5: memref<1x256xf32, #tpu.memory_space<vmem>>, %arg6: memref<256x256xbf16, #tpu.memory_space<vmem>>, %arg7: memref<1x256xf32, #tpu.memory_space<vmem>>, %arg8: memref<16x256xbf16, #tpu.memory_space<vmem>>) attributes {dimension_semantics = [#tpu.dimension_semantics<parallel>], iteration_bounds = array<i64: 1>, scalar_prefetch = 0 : i64, scratch_operands = 0 : i64, tpu.core_type = #tpu.core_type<tc>, window_params = [{transform_indices = @transform_0, window_bounds = array<i64: 16, 128>}, {pipeline_mode = #tpu.pipeline_mode<synchronous>, transform_indices = @transform_1, window_bounds = array<i64: 128, 256>}, {pipeline_mode = #tpu.pipeline_mode<synchronous>, transform_indices = @transform_2, window_bounds = array<i64: 1, 256>}, {pipeline_mode = #tpu.pipeline_mode<synchronous>, transform_indices = @transform_3, window_bounds = array<i64: 256, 256>}, {pipeline_mode = #tpu.pipeline_mode<synchronous>, transform_indices = @transform_4, window_bounds = array<i64: 1, 256>}, {pipeline_mode = #tpu.pipeline_mode<synchronous>, transform_indices = @transform_5, window_bounds = array<i64: 256, 256>}, {pipeline_mode = #tpu.pipeline_mode<synchronous>, transform_indices = @transform_6, window_bounds = array<i64: 1, 256>}, {transform_indices = @transform_7, window_bounds = array<i64: 16, 256>}]} {
    %c0 = arith.constant 0 : index
    %c0_0 = arith.constant 0 : index
    %0 = vector.load %arg1[%c0, %c0_0] : memref<16x128xf32, #tpu.memory_space<vmem>>, vector<16x128xf32>
    %1 = arith.truncf %0 : vector<16x128xf32> to vector<16x128xbf16>
    %c0_1 = arith.constant 0 : index
    %c0_2 = arith.constant 0 : index
    %2 = vector.load %arg2[%c0_1, %c0_2] : memref<128x256xbf16, #tpu.memory_space<vmem>>, vector<128x256xbf16>
    %cst = arith.constant dense<0.000000e+00> : vector<16x256xf32>
    %3 = tpu.matmul %1, %2, %cst {dimension_numbers = #tpu.dot_dimension_numbers<[1], [0], [0], [1], [0, 0, 1, 1], [], []>} : vector<16x128xbf16>, vector<128x256xbf16>, vector<16x256xf32> -> vector<16x256xf32>
    %c0_3 = arith.constant 0 : index
    %c0_4 = arith.constant 0 : index
    %4 = vector.load %arg3[%c0_3, %c0_4] : memref<1x256xf32, #tpu.memory_space<vmem>>, vector<1x256xf32>
    %5 = vector.broadcast %4 : vector<1x256xf32> to vector<16x256xf32>
    %6 = arith.addf %3, %5 : vector<16x256xf32>
    %cst_5 = arith.constant 0.000000e+00 : f32
    %7 = vector.broadcast %cst_5 : f32 to vector<16x256xf32>
    %8 = arith.maximumf %6, %7 : vector<16x256xf32>
    %9 = arith.truncf %8 : vector<16x256xf32> to vector<16x256xbf16>
    %c0_6 = arith.constant 0 : index
    %c0_7 = arith.constant 0 : index
    %10 = vector.load %arg4[%c0_6, %c0_7] : memref<256x256xbf16, #tpu.memory_space<vmem>>, vector<256x256xbf16>
    %cst_8 = arith.constant dense<0.000000e+00> : vector<16x256xf32>
    %11 = tpu.matmul %9, %10, %cst_8 {dimension_numbers = #tpu.dot_dimension_numbers<[1], [0], [0], [1], [0, 0, 1, 1], [], []>} : vector<16x256xbf16>, vector<256x256xbf16>, vector<16x256xf32> -> vector<16x256xf32>
    %c0_9 = arith.constant 0 : index
    %c0_10 = arith.constant 0 : index
    %12 = vector.load %arg5[%c0_9, %c0_10] : memref<1x256xf32, #tpu.memory_space<vmem>>, vector<1x256xf32>
    %13 = vector.broadcast %12 : vector<1x256xf32> to vector<16x256xf32>
    %14 = arith.addf %11, %13 : vector<16x256xf32>
    %cst_11 = arith.constant 0.000000e+00 : f32
    %15 = vector.broadcast %cst_11 : f32 to vector<16x256xf32>
    %16 = arith.maximumf %14, %15 : vector<16x256xf32>
    %17 = arith.truncf %16 : vector<16x256xf32> to vector<16x256xbf16>
    %c0_12 = arith.constant 0 : index
    %c0_13 = arith.constant 0 : index
    %18 = vector.load %arg6[%c0_12, %c0_13] : memref<256x256xbf16, #tpu.memory_space<vmem>>, vector<256x256xbf16>
    %cst_14 = arith.constant dense<0.000000e+00> : vector<16x256xf32>
    %19 = tpu.matmul %17, %18, %cst_14 {dimension_numbers = #tpu.dot_dimension_numbers<[1], [0], [0], [1], [0, 0, 1, 1], [], []>} : vector<16x256xbf16>, vector<256x256xbf16>, vector<16x256xf32> -> vector<16x256xf32>
    %c0_15 = arith.constant 0 : index
    %c0_16 = arith.constant 0 : index
    %20 = vector.load %arg7[%c0_15, %c0_16] : memref<1x256xf32, #tpu.memory_space<vmem>>, vector<1x256xf32>
    %21 = vector.broadcast %20 : vector<1x256xf32> to vector<16x256xf32>
    %22 = arith.addf %19, %21 : vector<16x256xf32>
    %23 = arith.truncf %22 : vector<16x256xf32> to vector<16x256xbf16>
    %c0_17 = arith.constant 0 : index
    %c0_18 = arith.constant 0 : index
    %24 = vector.load %arg8[%c0_17, %c0_18] : memref<16x256xbf16, #tpu.memory_space<vmem>>, vector<16x256xbf16>
    tpu.vector_store %arg8[%c0_17, %c0_18], %23 {strides = array<i32>} : memref<16x256xbf16, #tpu.memory_space<vmem>>, vector<16x256xbf16>,
    return
  }
  func.func @transform_0(%arg0: i32) -> (i32, i32) {
    %c0_i32 = arith.constant 0 : i32
    %c0_i32_0 = arith.constant 0 : i32
    return %arg0, %c0_i32 : i32, i32
  }
  func.func @transform_1(%arg0: i32) -> (i32, i32) {
    %c0_i32 = arith.constant 0 : i32
    %c0_i32_0 = arith.constant 0 : i32
    %c0_i32_1 = arith.constant 0 : i32
    return %c0_i32, %c0_i32_0 : i32, i32
  }
  func.func @transform_2(%arg0: i32) -> (i32, i32) {
    %c0_i32 = arith.constant 0 : i32
    %c0_i32_0 = arith.constant 0 : i32
    %c0_i32_1 = arith.constant 0 : i32
    return %c0_i32, %c0_i32_0 : i32, i32
  }
  func.func @transform_3(%arg0: i32) -> (i32, i32) {
    %c0_i32 = arith.constant 0 : i32
    %c0_i32_0 = arith.constant 0 : i32
    %c0_i32_1 = arith.constant 0 : i32
    return %c0_i32, %c0_i32_0 : i32, i32
  }
  func.func @transform_4(%arg0: i32) -> (i32, i32) {
    %c0_i32 = arith.constant 0 : i32
    %c0_i32_0 = arith.constant 0 : i32
    %c0_i32_1 = arith.constant 0 : i32
    return %c0_i32, %c0_i32_0 : i32, i32
  }
  func.func @transform_5(%arg0: i32) -> (i32, i32) {
    %c0_i32 = arith.constant 0 : i32
    %c0_i32_0 = arith.constant 0 : i32
    %c0_i32_1 = arith.constant 0 : i32
    return %c0_i32, %c0_i32_0 : i32, i32
  }
  func.func @transform_6(%arg0: i32) -> (i32, i32) {
    %c0_i32 = arith.constant 0 : i32
    %c0_i32_0 = arith.constant 0 : i32
    %c0_i32_1 = arith.constant 0 : i32
    return %c0_i32, %c0_i32_0 : i32, i32
  }
  func.func @transform_7(%arg0: i32) -> (i32, i32) {
    %c0_i32 = arith.constant 0 : i32
    %c0_i32_0 = arith.constant 0 : i32
    return %arg0, %c0_i32 : i32, i32
  }
}

</mosaic_0001>

<bundles_post_ra>
// kernel: mlp_ffn_neck.1
= control target key start
LH: loop header
LB: loop body
LE: loop exit
PB: predicated region body
PF: predicated region fallthrough
CT: control target
= control target key end

     0   :  { %12 = vsyncpa [#allocation3], 0  ;;  %s1292_s0 = inlined_call_operand.vmem [shape: f32[16,128], index: 0, kind: input, shape index: {}]   ;;  %s1293_s1 = inlined_call_operand.hbm [shape: bf16[128,256], index: 1, kind: input, shape index: {}]   ;;  %s1294_s2 = inlined_call_operand.vmem [shape: f32[1,256], index: 2, kind: input, shape index: {}]   ;;  %s1295_s3 = inlined_call_operand.hbm [shape: bf16[256,256], index: 3, kind: input, shape index: {}]   ;;  %s1296_s4 = inlined_call_operand.vmem [shape: f32[1,256], index: 4, kind: input, shape index: {}]   ;;  %s1297_s5 = inlined_call_operand.hbm [shape: bf16[256,256], index: 5, kind: input, shape index: {}]   ;;  %s1298_s6 = inlined_call_operand.vmem [shape: f32[1,256], index: 6, kind: input, shape index: {}]   ;;  %s1299_s7 = inlined_call_operand.vmem [shape: bf16[16,256], index: 7, kind: output, shape index: {}]  }
   0x1   :  { %13 = vsyncpa [#allocation5], 0  ;;  %s35_s26 = sshll.u32 %s1295_s3, 4  ;;  %s1217_s27 = smov [#allocation4]   ;;  %s36_s26 = int_to_ptr.hbm [resolvable:$true] %s35_s26 }
   0x2   :  { %s37_s28 = sshll.u32 %s1217_s27, 4  ;;  %s20_s8 = sshll.u32 %s1293_s1, 4  ;;  %s38_s28 = int_to_ptr.vmem [resolvable:$true] %s37_s28  ;;  %s21_s8 = int_to_ptr.hbm [resolvable:$true] %s20_s8 }
   0x3   :  { %s1218_s9 = smov 128   ;;  %s1219_s10 = smov 8  }
   0x4   :  { %43 = dma.hbm_to_vmem [thread:$0]  %s36_s26, 4096, %s38_s28, [#allocation5], %s1218_s9, %s1218_s9, %s1219_s10  }
   0x5   :  { %s1220_s11 = smov [#allocation2]   ;;  %s50_s15 = sshll.u32 %s1297_s5, 4  ;;  %s51_s15 = int_to_ptr.hbm [resolvable:$true] %s50_s15 }
   0x6   :  { %s22_s12 = sshll.u32 %s1220_s11, 4  ;;  %s1221_s3 = smov [#allocation6]   ;;  %s23_s12 = int_to_ptr.vmem [resolvable:$true] %s22_s12 }
   0x7   :  { %28 = dma.hbm_to_vmem [thread:$0]  %s21_s8, 2048, %s23_s12, [#allocation3], %s1218_s9, %s1218_s9, %s1219_s10  }
   0x8   :  { %s52_s16 = sshll.u32 %s1221_s3, 4  ;;  %s53_s16 = int_to_ptr.vmem [resolvable:$true] %s52_s16 }
   0x9   :  { %58 = dma.hbm_to_vmem [thread:$0]  %s51_s15, 4096, %s53_s16, [#allocation5], %s1218_s9, %s1218_s9, %s1219_s10  }
   0xa   :  { %1213 = dma.done.wait [#allocation3], 2048  }
   0xb   :  { %1214 = vsyncadd [#allocation3], 4294965248 }
   0xc   :  { %1215 = dma.done.wait [#allocation5], 8192  }
   0xd   :  { %1216 = vsyncadd [#allocation5], 4294959104  ;;  %v794_v0 = vld [vmem:[#allocation2 + $0x70] sm:$0xf]  ;;  %v1071_v1 = vld [vmem:[#allocation2 + $0x74] sm:$0xf0] }
   0xe   :  { %v1070_v2 = vld [vmem:[#allocation2 + $0x74] sm:$0xf]  ;;  %v795_v3 = vor.u32 %v1071_v1, %v794_v0  ;;  %v796_v4 = vld [vmem:[#allocation2 + $0x78] sm:$0xf0]  ;;  %v786_v5 = vld [vmem:[#allocation2 + $0x60] sm:$0xf] }
   0xf   :  { %v1069_v6 = vld [vmem:[#allocation2 + $0x64] sm:$0xf0]  ;;  %v799_v7 = vor.u32 %v1070_v2, %v796_v4  ;;  %v1068_v8 = vld [vmem:[#allocation2 + $0x64] sm:$0xf]  ;;  %v788_v9 = vld [vmem:[#allocation2 + $0x68] sm:$0xf0] }
  0x10   :  { %178 = vmatpush.bf16.msra.mxu0 %v795_v3  ;;  %v787_v10 = vor.u32 %v1069_v6, %v786_v5  ;;  %v791_v11 = vor.u32 %v1068_v8, %v788_v9  ;;  %v778_v12 = vld [vmem:[#allocation2 + $0x50] sm:$0xf]  ;;  %v1067_v13 = vld [vmem:[#allocation2 + $0x54] sm:$0xf0]  ;;  %v1066_v14 = vld [vmem:[#allocation2 + $0x54] sm:$0xf] }
  0x11   :  { %192 = vmatpush.bf16.msra.mxu1 %v799_v7  ;;  %v780_v15 = vld [vmem:[#allocation2 + $0x58] sm:$0xf0]  ;;  %v779_v16 = vor.u32 %v1067_v13, %v778_v12  ;;  %v770_v18 = vld [vmem:[#allocation2 + $0x40] sm:$0xf]  ;;  %v1065_v19 = vld [vmem:[#allocation2 + $0x44] sm:$0xf0] }
  0x12   :  { %v783_v17 = vor.u32 %v1066_v14, %v780_v15  ;;  %v1064_v20 = vld [vmem:[#allocation2 + $0x44] sm:$0xf]  ;;  %v772_v21 = vld [vmem:[#allocation2 + $0x48] sm:$0xf0]  ;;  %v771_v22 = vor.u32 %v1065_v19, %v770_v18  ;;  %v762_v23 = vld [vmem:[#allocation2 + $0x30] sm:$0xf] }
  0x13   :  { %v858_v24 = vld [vmem:[#allocation4 + $0x70] sm:$0xf]  ;;  %v1087_v25 = vld [vmem:[#allocation4 + $0x74] sm:$0xf0]  ;;  %v775_v26 = vor.u32 %v1064_v20, %v772_v21  ;;  %v1062_v31 = vld [vmem:[#allocation2 + $0x34] sm:$0xf] }
  0x14   :  { %179 = vmatpush.bf16.msra.mxu0 %v787_v10  ;;  %v1063_v27 = vld [vmem:[#allocation2 + $0x34] sm:$0xf0]  ;;  %v859_v28 = vor.u32 %v1087_v25, %v858_v24  ;;  %v922_v29 = vld [vmem:[#allocation4 + $0xf0] sm:$0xf]  ;;  %v764_v32 = vld [vmem:[#allocation2 + $0x38] sm:$0xf0] }
  0x15   :  { %193 = vmatpush.bf16.msra.mxu1 %v791_v11  ;;  %v1103_v30 = vld [vmem:[#allocation4 + $0xf4] sm:$0xf0]  ;;  %v850_v34 = vld [vmem:[#allocation4 + $0x60] sm:$0xf]  ;;  %v1085_v35 = vld [vmem:[#allocation4 + $0x64] sm:$0xf0]  ;;  %v763_v37 = vor.u32 %v1063_v27, %v762_v23  ;;  %v767_v42 = vor.u32 %v1062_v31, %v764_v32 }
  0x16   :  { %v923_v33 = vor.u32 %v1103_v30, %v922_v29  ;;  %410 = vmatpush.bf16.msra.mxu2 %v859_v28  ;;  %v914_v36 = vld [vmem:[#allocation4 + $0xe0] sm:$0xf]  ;;  %v1061_v39 = vld [vmem:[#allocation2 + $0x24] sm:$0xf0]  ;;  %v851_v40 = vor.u32 %v1085_v35, %v850_v34  ;;  %v1060_v43 = vld [vmem:[#allocation2 + $0x24] sm:$0xf] }
  0x17   :  { %v754_v38 = vld [vmem:[#allocation2 + $0x20] sm:$0xf]  ;;  %v1101_v41 = vld [vmem:[#allocation4 + $0xe4] sm:$0xf0]  ;;  %v756_v44 = vld [vmem:[#allocation2 + $0x28] sm:$0xf0] }
  0x18   :  { %180 = vmatpush.bf16.msra.mxu0 %v779_v16  ;;  %424 = vmatpush.bf16.msra.mxu3 %v923_v33  ;;  %v915_v45 = vor.u32 %v1101_v41, %v914_v36  ;;  %v842_v46 = vld [vmem:[#allocation4 + $0x50] sm:$0xf]  ;;  %v1083_v47 = vld [vmem:[#allocation4 + $0x54] sm:$0xf0]  ;;  %v755_v51 = vor.u32 %v1061_v39, %v754_v38  ;;  %v834_v54 = vld [vmem:[#allocation4 + $0x40] sm:$0xf]  ;;  %v759_v56 = vor.u32 %v1060_v43, %v756_v44 }
  0x19   :  { %194 = vmatpush.bf16.msra.mxu1 %v783_v17  ;;  %v906_v48 = vld [vmem:[#allocation4 + $0xd0] sm:$0xf]  ;;  %v1099_v49 = vld [vmem:[#allocation4 + $0xd4] sm:$0xf0]  ;;  %v843_v50 = vor.u32 %v1083_v47, %v842_v46  ;;  %v1081_v55 = vld [vmem:[#allocation4 + $0x44] sm:$0xf0] }
  0x1a   :  { %411 = vmatpush.bf16.msra.mxu2 %v851_v40  ;;  %v746_v52 = vld [vmem:[#allocation2 + $0x10] sm:$0xf]  ;;  %v907_v53 = vor.u32 %v1099_v49, %v906_v48  ;;  %v1059_v57 = vld [vmem:[#allocation2 + $0x14] sm:$0xf0]  ;;  %v898_v58 = vld [vmem:[#allocation4 + $0xc0] sm:$0xf]  ;;  %v835_v62 = vor.u32 %v1081_v55, %v834_v54 }
  0x1b   :  { %v1097_v59 = vld [vmem:[#allocation4 + $0xc4] sm:$0xf0]  ;;  %v1058_v60 = vld [vmem:[#allocation2 + $0x14] sm:$0xf]  ;;  %v748_v61 = vld [vmem:[#allocation2 + $0x18] sm:$0xf0]  ;;  %v747_v63 = vor.u32 %v1059_v57, %v746_v52 }
  0x1c   :  { %181 = vmatpush.bf16.msra.mxu0 %v771_v22  ;;  %425 = vmatpush.bf16.msra.mxu3 %v915_v45  ;;  %v899_v0 = vor.u32 %v1097_v59, %v898_v58  ;;  %v751_v1 = vor.u32 %v1058_v60, %v748_v61  ;;  %v738_v2 = vld [vmem:[#allocation2] sm:$0xf]  ;;  %v1057_v3 = vld [vmem:[#allocation2 + $0x4] sm:$0xf0]  ;;  %v1056_v4 = vld [vmem:[#allocation2 + $0x4] sm:$0xf] }
  0x1d   :  { %195 = vmatpush.bf16.msra.mxu1 %v775_v26  ;;  %v740_v5 = vld [vmem:[#allocation2 + $0x8] sm:$0xf0]  ;;  %v1086_v6 = vld [vmem:[#allocation4 + $0x74] sm:$0xf]  ;;  %v860_v7 = vld [vmem:[#allocation4 + $0x78] sm:$0xf0]  ;;  %v739_v10 = vor.u32 %v1057_v3, %v738_v2 }
  0x1e   :  { %412 = vmatpush.bf16.msra.mxu2 %v843_v50  ;;  %v1102_v8 = vld [vmem:[#allocation4 + $0xf4] sm:$0xf]  ;;  %v924_v9 = vld [vmem:[#allocation4 + $0xf8] sm:$0xf0]  ;;  %v73_v11 = vld [vmem:[%s1292_s0] sm:$0xff]  ;;  %v743_v13 = vor.u32 %v1056_v4, %v740_v5  ;;  %v863_v14 = vor.u32 %v1086_v6, %v860_v7 }
  0x1f   :  { %v74_v12 = vld [vmem:[%s1292_s0 + $0x8] sm:$0xff]  ;;  %v927_v15 = vor.u32 %v1102_v8, %v924_v9  ;;  %v1084_v16 = vld [vmem:[#allocation4 + $0x64] sm:$0xf]  ;;  %v1082_v23 = vld [vmem:[#allocation4 + $0x54] sm:$0xf] }
  0x20   :  { %182 = vmatpush.bf16.msra.mxu0 %v763_v37  ;;  %426 = vmatpush.bf16.msra.mxu3 %v907_v53  ;;  %v852_v17 = vld [vmem:[#allocation4 + $0x68] sm:$0xf0]  ;;  %v75_v18 = vpack.c.bf16 %v74_v12, %v73_v11  ;;  %v1100_v19 = vld [vmem:[#allocation4 + $0xe4] sm:$0xf]  ;;  %v844_v24 = vld [vmem:[#allocation4 + $0x58] sm:$0xf0] }
  0x21   :  { %196 = vmatpush.bf16.msra.mxu1 %v767_v42  ;;  %v916_v20 = vld [vmem:[#allocation4 + $0xe8] sm:$0xf0]  ;;  %v855_v21 = vor.u32 %v1084_v16, %v852_v17  ;;  %v1098_v25 = vld [vmem:[#allocation4 + $0xd4] sm:$0xf]  ;;  %v908_v26 = vld [vmem:[#allocation4 + $0xd8] sm:$0xf0]  ;;  %v847_v27 = vor.u32 %v1082_v23, %v844_v24 }
  0x22   :  { %413 = vmatpush.bf16.msra.mxu2 %v835_v62  ;;  %v919_v22 = vor.u32 %v1100_v19, %v916_v20  ;;  %v911_v28 = vor.u32 %v1098_v25, %v908_v26  ;;  %v1080_v29 = vld [vmem:[#allocation4 + $0x44] sm:$0xf]  ;;  %v836_v30 = vld [vmem:[#allocation4 + $0x48] sm:$0xf0]  ;;  %v826_v35 = vld [vmem:[#allocation4 + $0x30] sm:$0xf] }
  0x23   :  { %v1096_v31 = vld [vmem:[#allocation4 + $0xc4] sm:$0xf]  ;;  %v900_v32 = vld [vmem:[#allocation4 + $0xc8] sm:$0xf0]  ;;  %v839_v33 = vor.u32 %v1080_v29, %v836_v30  ;;  %v1079_v36 = vld [vmem:[#allocation4 + $0x34] sm:$0xf0] }
  0x24   :  { %183 = vmatpush.bf16.msra.mxu0 %v755_v51  ;;  %427 = vmatpush.bf16.msra.mxu3 %v899_v0  ;;  %v903_v34 = vor.u32 %v1096_v31, %v900_v32  ;;  %v890_v37 = vld [vmem:[#allocation4 + $0xb0] sm:$0xf]  ;;  %v827_v38 = vor.u32 %v1079_v36, %v826_v35  ;;  %v1095_v39 = vld [vmem:[#allocation4 + $0xb4] sm:$0xf0]  ;;  %v1078_v40 = vld [vmem:[#allocation4 + $0x34] sm:$0xf] }
  0x25   :  { %197 = vmatpush.bf16.msra.mxu1 %v759_v56  ;;  %v828_v41 = vld [vmem:[#allocation4 + $0x38] sm:$0xf0]  ;;  %v891_v42 = vor.u32 %v1095_v39, %v890_v37  ;;  %v1094_v44 = vld [vmem:[#allocation4 + $0xb4] sm:$0xf]  ;;  %v818_v47 = vld [vmem:[#allocation4 + $0x20] sm:$0xf] }
  0x26   :  { %v831_v43 = vor.u32 %v1078_v40, %v828_v41  ;;  %v892_v45 = vld [vmem:[#allocation4 + $0xb8] sm:$0xf0]  ;;  %414 = vmatpush.bf16.msra.mxu2 %v827_v38  ;;  %v1077_v48 = vld [vmem:[#allocation4 + $0x24] sm:$0xf0]  ;;  %v882_v50 = vld [vmem:[#allocation4 + $0xa0] sm:$0xf] }
  0x27   :  { %v895_v46 = vor.u32 %v1094_v44, %v892_v45  ;;  %v819_v49 = vor.u32 %v1077_v48, %v818_v47  ;;  %v1093_v51 = vld [vmem:[#allocation4 + $0xa4] sm:$0xf0]  ;;  %v1076_v52 = vld [vmem:[#allocation4 + $0x24] sm:$0xf]  ;;  %v820_v54 = vld [vmem:[#allocation4 + $0x28] sm:$0xf0] }
  0x28   :  { %184 = vmatpush.bf16.msra.mxu0 %v747_v63  ;;  %428 = vmatpush.bf16.msra.mxu3 %v891_v42  ;;  %v883_v53 = vor.u32 %v1093_v51, %v882_v50  ;;  %v1092_v55 = vld [vmem:[#allocation4 + $0xa4] sm:$0xf]  ;;  %v884_v56 = vld [vmem:[#allocation4 + $0xa8] sm:$0xf0]  ;;  %v823_v57 = vor.u32 %v1076_v52, %v820_v54  ;;  %v810_v59 = vld [vmem:[#allocation4 + $0x10] sm:$0xf] }
  0x29   :  { %198 = vmatpush.bf16.msra.mxu1 %v751_v1  ;;  %v887_v58 = vor.u32 %v1092_v55, %v884_v56  ;;  %v1075_v60 = vld [vmem:[#allocation4 + $0x14] sm:$0xf0]  ;;  %v874_v61 = vld [vmem:[#allocation4 + $0x90] sm:$0xf]  ;;  %v1074_v0 = vld [vmem:[#allocation4 + $0x14] sm:$0xf] }
  0x2a   :  { %415 = vmatpush.bf16.msra.mxu2 %v819_v49  ;;  %v811_v62 = vor.u32 %v1075_v60, %v810_v59  ;;  %v1091_v63 = vld [vmem:[#allocation4 + $0x94] sm:$0xf0]  ;;  %v812_v1 = vld [vmem:[#allocation4 + $0x18] sm:$0xf0]  ;;  %v1090_v4 = vld [vmem:[#allocation4 + $0x94] sm:$0xf] }
  0x2b   :  { %v875_v2 = vor.u32 %v1091_v63, %v874_v61  ;;  %v815_v3 = vor.u32 %v1074_v0, %v812_v1  ;;  %v876_v5 = vld [vmem:[#allocation4 + $0x98] sm:$0xf0]  ;;  %v802_v7 = vld [vmem:[#allocation4] sm:$0xf]  ;;  %v1073_v8 = vld [vmem:[#allocation4 + $0x4] sm:$0xf0] }
  0x2c   :  { %185 = vmatpush.bf16.msra.mxu0 %v739_v10  ;;  %429 = vmatpush.bf16.msra.mxu3 %v883_v53  ;;  %v879_v6 = vor.u32 %v1090_v4, %v876_v5  ;;  %v866_v9 = vld [vmem:[#allocation4 + $0x80] sm:$0xf]  ;;  %v803_v10 = vor.u32 %v1073_v8, %v802_v7  ;;  %v1089_v11 = vld [vmem:[#allocation4 + $0x84] sm:$0xf0]  ;;  %v1072_v12 = vld [vmem:[#allocation4 + $0x4] sm:$0xf] }
  0x2d   :  { %199 = vmatpush.bf16.msra.mxu1 %v743_v13  ;;  %v804_v13 = vld [vmem:[#allocation4 + $0x8] sm:$0xf0]  ;;  %v1088_v16 = vld [vmem:[#allocation4 + $0x84] sm:$0xf]  ;;  %v1050_v19 = vld [vmem:[#allocation6 + $0xf0] sm:$0xf] }
  0x2e   :  { %416 = vmatpush.bf16.msra.mxu2 %v811_v62  ;;  %v868_v17 = vld [vmem:[#allocation4 + $0x88] sm:$0xf0]  ;;  %v1135_v20 = vld [vmem:[#allocation6 + $0xf4] sm:$0xf0]  ;;  %v1052_v23 = vld [vmem:[#allocation6 + $0xf8] sm:$0xf0] }
  0x2f   :  { %186 = vmatmul.bf16.vlgmr.msra.gmra.mxu0 %v75_v18  ;;  %v1042_v24 = vld [vmem:[#allocation6 + $0xe0] sm:$0xf]  ;;  %v1133_v25 = vld [vmem:[#allocation6 + $0xe4] sm:$0xf0]  ;;  %v986_v29 = vld [vmem:[#allocation6 + $0x70] sm:$0xf] }
  0x30   :  { %438 = vmatpush.bf16.msrb.mxu0 %v863_v14  ;;  %200 = vmatmul.bf16.vlgmr.msra.gmra.mxu1 %v75_v18  ;;  %v867_v14 = vor.u32 %v1089_v11, %v866_v9  ;;  %v871_v18 = vor.u32 %v1088_v16, %v868_v17  ;;  %v1043_v30 = vor.u32 %v1133_v25, %v1042_v24  ;;  %v1119_v31 = vld [vmem:[#allocation6 + $0x74] sm:$0xf0]  ;;  %v1118_v32 = vld [vmem:[#allocation6 + $0x74] sm:$0xf]  ;;  %v1034_v37 = vld [vmem:[#allocation6 + $0xd0] sm:$0xf] }
  0x31   :  { %452 = vmatpush.bf16.msrb.mxu1 %v927_v15  ;;  %430 = vmatpush.bf16.msra.mxu3 %v875_v2  ;;  %v807_v15 = vor.u32 %v1072_v12, %v804_v13  ;;  %v987_v35 = vor.u32 %v1119_v31, %v986_v29  ;;  %v1131_v38 = vld [vmem:[#allocation6 + $0xd4] sm:$0xf0]  ;;  %v1130_v39 = vld [vmem:[#allocation6 + $0xd4] sm:$0xf]  ;;  %v1036_v40 = vld [vmem:[#allocation6 + $0xd8] sm:$0xf0] }
  0x32   :  { %417 = vmatpush.bf16.msra.mxu2 %v803_v10  ;;  %v978_v41 = vld [vmem:[#allocation6 + $0x60] sm:$0xf]  ;;  %v1117_v42 = vld [vmem:[#allocation6 + $0x64] sm:$0xf0]  ;;  %v1116_v44 = vld [vmem:[#allocation6 + $0x64] sm:$0xf]  ;;  %v1039_v48 = vor.u32 %v1130_v39, %v1036_v40 }
  0x33   :  { %v980_v45 = vld [vmem:[#allocation6 + $0x68] sm:$0xf0]  ;;  %v1026_v49 = vld [vmem:[#allocation6 + $0xc0] sm:$0xf]  ;;  %v1129_v50 = vld [vmem:[#allocation6 + $0xc4] sm:$0xf0] }
  0x34   :  { %439 = vmatpush.bf16.msrb.mxu0 %v855_v21  ;;  %v1134_v21 = vld [vmem:[#allocation6 + $0xf4] sm:$0xf]  ;;  %v983_v47 = vor.u32 %v1116_v44, %v980_v45  ;;  %v1128_v51 = vld [vmem:[#allocation6 + $0xc4] sm:$0xf]  ;;  %v1028_v52 = vld [vmem:[#allocation6 + $0xc8] sm:$0xf0]  ;;  %v1027_v53 = vor.u32 %v1129_v50, %v1026_v49 }
  0x35   :  { %453 = vmatpush.bf16.msrb.mxu1 %v919_v22  ;;  %431 = vmatpush.bf16.msra.mxu3 %v867_v14  ;;  %v1051_v22 = vor.u32 %v1135_v20, %v1050_v19  ;;  %v1055_v26 = vor.u32 %v1134_v21, %v1052_v23  ;;  %v1031_v54 = vor.u32 %v1128_v51, %v1028_v52  ;;  %v92_v55 = vld [vmem:[%s1294_s2] sm:$0x3]  ;;  %v970_v8 = vld [vmem:[#allocation6 + $0x50] sm:$0xf]  ;;  %v1115_v9 = vld [vmem:[#allocation6 + $0x54] sm:$0xf0] }
  0x36   :  { %670 = vmatpush.bf16.msrb.mxu2 %v987_v35  ;;  %v95_v59 = vperm.slane %v92_v55, 1  ;;  %v1114_v10 = vld [vmem:[#allocation6 + $0x54] sm:$0xf]  ;;  %v971_v11 = vor.u32 %v1115_v9, %v970_v8  ;;  %v972_v12 = vld [vmem:[#allocation6 + $0x58] sm:$0xf0] }
  0x37   :  { %v975_v13 = vor.u32 %v1114_v10, %v972_v12  ;;  %v1018_v14 = vld [vmem:[#allocation6 + $0xb0] sm:$0xf]  ;;  %v1126_v16 = vld [vmem:[#allocation6 + $0xb4] sm:$0xf]  ;;  %v962_v20 = vld [vmem:[#allocation6 + $0x40] sm:$0xf] }
  0x38   :  { %440 = vmatpush.bf16.msrb.mxu0 %v847_v27  ;;  %v1132_v27 = vld [vmem:[#allocation6 + $0xe4] sm:$0xf]  ;;  %v1113_v21 = vld [vmem:[#allocation6 + $0x44] sm:$0xf0]  ;;  %v964_v24 = vld [vmem:[#allocation6 + $0x48] sm:$0xf0] }
  0x39   :  { %454 = vmatpush.bf16.msrb.mxu1 %v911_v28  ;;  %v1044_v28 = vld [vmem:[#allocation6 + $0xe8] sm:$0xf0]  ;;  %684 = vmatpush.bf16.msrb.mxu3 %v1051_v22  ;;  %v1112_v22 = vld [vmem:[#allocation6 + $0x44] sm:$0xf]  ;;  %v963_v23 = vor.u32 %v1113_v21, %v962_v20  ;;  %v1123_v39 = vld [vmem:[#allocation6 + $0x94] sm:$0xf0] }
  0x3a   :  { %v967_v25 = vor.u32 %v1112_v22, %v964_v24  ;;  %v1122_v40 = vld [vmem:[#allocation6 + $0x94] sm:$0xf]  ;;  %v946_v44 = vld [vmem:[#allocation6 + $0x20] sm:$0xf]  ;;  %v1109_v45 = vld [vmem:[#allocation6 + $0x24] sm:$0xf0] }
  0x3b   :  { %v994_v50 = vld [vmem:[#allocation6 + $0x80] sm:$0xf]  ;;  %v1121_v51 = vld [vmem:[#allocation6 + $0x84] sm:$0xf0]  ;;  %v1120_v52 = vld [vmem:[#allocation6 + $0x84] sm:$0xf] }
  0x3c   :  { %441 = vmatpush.bf16.msrb.mxu0 %v839_v33  ;;  %v988_v33 = vld [vmem:[#allocation6 + $0x78] sm:$0xf0] }
  0x3d   :  { %455 = vmatpush.bf16.msrb.mxu1 %v903_v34  ;;  %v1047_v34 = vor.u32 %v1132_v27, %v1044_v28  ;;  %v991_v36 = vor.u32 %v1118_v32, %v988_v33  ;;  %685 = vmatpush.bf16.msrb.mxu3 %v1043_v30  ;;  %v1125_v27 = vld [vmem:[#allocation6 + $0xa4] sm:$0xf0]  ;;  %v1124_v28 = vld [vmem:[#allocation6 + $0xa4] sm:$0xf]  ;;  %v1012_v30 = vld [vmem:[#allocation6 + $0xa8] sm:$0xf0] }
  0x3e   :  { %v1015_v31 = vor.u32 %v1124_v28, %v1012_v30  ;;  %v954_v32 = vld [vmem:[#allocation6 + $0x30] sm:$0xf]  ;;  %v1111_v33 = vld [vmem:[#allocation6 + $0x34] sm:$0xf0] }
  0x3f   :  { %v955_v35 = vor.u32 %v1111_v33, %v954_v32 }
  0x40   :  { %442 = vmatpush.bf16.msrb.mxu0 %v831_v43  ;;  %v979_v43 = vor.u32 %v1117_v42, %v978_v41  ;;  %v1004_v42 = vld [vmem:[#allocation6 + $0x98] sm:$0xf0] }
  0x41   :  { %456 = vmatpush.bf16.msrb.mxu1 %v895_v46  ;;  %v1035_v46 = vor.u32 %v1131_v38, %v1034_v37  ;;  %v1002_v38 = vld [vmem:[#allocation6 + $0x90] sm:$0xf] }
  0x42   :  { %671 = vmatpush.bf16.msrb.mxu2 %v979_v43  ;;  %v1003_v41 = vor.u32 %v1123_v39, %v1002_v38  ;;  %v1007_v43 = vor.u32 %v1122_v40, %v1004_v42 }
  0x43   :  { %686 = vmatpush.bf16.msrb.mxu3 %v1035_v46  ;;  %v1108_v46 = vld [vmem:[#allocation6 + $0x24] sm:$0xf] }
  0x44   :  { %443 = vmatpush.bf16.msrb.mxu0 %v823_v57 }
  0x45   :  { %457 = vmatpush.bf16.msrb.mxu1 %v887_v58  ;;  %v94_v58 = vperm.slane %v92_v55, 0 }
  0x46   :  { %672 = vmatpush.bf16.msrb.mxu2 %v971_v11 }
  0x47   :  { %687 = vmatpush.bf16.msrb.mxu3 %v1027_v53  ;;  %v995_v53 = vor.u32 %v1121_v51, %v994_v50 }
  0x48   :  { %444 = vmatpush.bf16.msrb.mxu0 %v815_v3 }
  0x49   :  { %458 = vmatpush.bf16.msrb.mxu1 %v879_v6 }
  0x4a   :  { %673 = vmatpush.bf16.msrb.mxu2 %v963_v23 }
  0x4c   :  { %445 = vmatpush.bf16.msrb.mxu0 %v807_v15  ;;  %v1127_v15 = vld [vmem:[#allocation6 + $0xb4] sm:$0xf0] }
  0x4d   :  { %459 = vmatpush.bf16.msrb.mxu1 %v871_v18  ;;  %v1019_v17 = vor.u32 %v1127_v15, %v1018_v14  ;;  %v1020_v18 = vld [vmem:[#allocation6 + $0xb8] sm:$0xf0] }
  0x4e   :  { %v1023_v19 = vor.u32 %v1126_v16, %v1020_v18  ;;  %674 = vmatpush.bf16.msrb.mxu2 %v955_v35 }
  0x4f   :  { %688 = vmatpush.bf16.msrb.mxu3 %v1019_v17 }
  0x50   :  { %698 = vmatpush.bf16.msra.mxu0 %v991_v36  ;;  %v956_v36 = vld [vmem:[#allocation6 + $0x38] sm:$0xf0] }
  0x51   :  { %712 = vmatpush.bf16.msra.mxu1 %v1055_v26  ;;  %v1010_v26 = vld [vmem:[#allocation6 + $0xa0] sm:$0xf] }
  0x52   :  { %v1011_v29 = vor.u32 %v1125_v27, %v1010_v26 }
  0x54   :  { %699 = vmatpush.bf16.msra.mxu0 %v983_v47  ;;  %689 = vmatpush.bf16.msrb.mxu3 %v1011_v29  ;;  %v947_v47 = vor.u32 %v1109_v45, %v946_v44  ;;  %v504_v29 = vld [vmem:[%s1298_s6] sm:$0x3] }
  0x55   :  { %713 = vmatpush.bf16.msra.mxu1 %v1047_v34  ;;  %v1110_v34 = vld [vmem:[#allocation6 + $0x34] sm:$0xf]  ;;  %v506_v32 = vperm.slane %v504_v29, 0 }
  0x56   :  { %v959_v37 = vor.u32 %v1110_v34, %v956_v36  ;;  %675 = vmatpush.bf16.msrb.mxu2 %v947_v47 }
  0x58   :  { %700 = vmatpush.bf16.msra.mxu0 %v975_v13  ;;  %690 = vmatpush.bf16.msrb.mxu3 %v1003_v41 }
  0x59   :  { %714 = vmatpush.bf16.msra.mxu1 %v1039_v48  ;;  %v948_v48 = vld [vmem:[#allocation6 + $0x28] sm:$0xf0] }
  0x5a   :  { %v951_v49 = vor.u32 %v1108_v46, %v948_v48 }
  0x5c   :  { %701 = vmatpush.bf16.msra.mxu0 %v967_v25  ;;  %691 = vmatpush.bf16.msrb.mxu3 %v995_v53 }
  0x5d   :  { %715 = vmatpush.bf16.msra.mxu1 %v1031_v54  ;;  %v996_v54 = vld [vmem:[#allocation6 + $0x88] sm:$0xf0] }
  0x5e   :  { %v999_v55 = vor.u32 %v1120_v52, %v996_v54 }
  0x60   :  { %702 = vmatpush.bf16.msra.mxu0 %v959_v37 }
  0x61   :  { %716 = vmatpush.bf16.msra.mxu1 %v1023_v19 }
  0x64   :  { %703 = vmatpush.bf16.msra.mxu0 %v951_v49 }
  0x65   :  { %717 = vmatpush.bf16.msra.mxu1 %v1015_v31  ;;  %v507_v31 = vperm.slane %v504_v29, 1 }
  0x69   :  { %718 = vmatpush.bf16.msra.mxu1 %v1007_v43 }
  0x6d   :  { %719 = vmatpush.bf16.msra.mxu1 %v999_v55 }
  0xac   :  { %v187_v56 = vpop.f32.mrf.mxu0 }
  0xad   :  { %v201_v57 = vpop.f32.mrf.mxu1  ;;  %v188_v60 = vadd.f32 %v187_v56, %v94_v58  ;;  %v938_v56 = vld [vmem:[#allocation6 + $0x10] sm:$0xf] }
  0xae   :  { %v202_v61 = vadd.f32 %v201_v57, %v95_v59  ;;  %v1107_v57 = vld [vmem:[#allocation6 + $0x14] sm:$0xf0] }
  0xaf   :  { %v206_v2 = vmax.f32 %v188_v60, 0.0  ;;  %v940_v60 = vld [vmem:[#allocation6 + $0x18] sm:$0xf0] }
  0xb0   :  { %v207_v4 = vmax.f32 %v202_v61, 0.0 }
  0xb4   :  { %v189_v62 = vpop.f32.mrf.mxu0 }
  0xb5   :  { %v190_v63 = vadd.f32 %v189_v62, %v94_v58  ;;  %v203_v0 = vpop.f32.mrf.mxu1  ;;  %v1106_v58 = vld [vmem:[#allocation6 + $0x14] sm:$0xf]  ;;  %v930_v62 = vld [vmem:[#allocation6] sm:$0xf] }
  0xb6   :  { %v204_v1 = vadd.f32 %v203_v0, %v95_v59  ;;  %v939_v59 = vor.u32 %v1107_v57, %v938_v56  ;;  %v943_v61 = vor.u32 %v1106_v58, %v940_v60  ;;  %v1104_v0 = vld [vmem:[#allocation6 + $0x4] sm:$0xf] }
  0xb7   :  { %v208_v3 = vmax.f32 %v190_v63, 0.0  ;;  %v1105_v63 = vld [vmem:[#allocation6 + $0x4] sm:$0xf0] }
  0xb8   :  { %v209_v5 = vmax.f32 %v204_v1, 0.0  ;;  %676 = vmatpush.bf16.msrb.mxu2 %v939_v59  ;;  %704 = vmatpush.bf16.msra.mxu0 %v943_v61  ;;  %v931_v1 = vor.u32 %v1105_v63, %v930_v62 }
  0xb9   :  { %v210_v6 = vpack.c.bf16 %v208_v3, %v206_v2  ;;  %v932_v2 = vld [vmem:[#allocation6 + $0x8] sm:$0xf0] }
  0xba   :  { %v211_v7 = vpack.c.bf16 %v209_v5, %v207_v4  ;;  %v935_v3 = vor.u32 %v1104_v0, %v932_v2  ;;  %v244_v4 = vld [vmem:[%s1296_s4] sm:$0x3] }
  0xbb   :  { %418 = vmatmul.bf16.vlgmr.msra.gmra.mxu2 %v210_v6  ;;  %446 = vmatmul.bf16.vlgmr.msrb.gmra.mxu0 %v210_v6  ;;  %v247_v6 = vperm.slane %v244_v4, 1  ;;  %v246_v10 = vperm.slane %v244_v4, 0 }
  0xbc   :  { %432 = vmatmul.bf16.vlgmr.msra.gmra.mxu3 %v211_v7  ;;  %460 = vmatmul.bf16.vlgmr.msrb.gmra.mxu1 %v211_v7 }
  0xbd   :  { %677 = vmatpush.bf16.msrb.mxu2 %v931_v1  ;;  %705 = vmatpush.bf16.msra.mxu0 %v935_v3 }
 0x138   :  { %v447_v5 = vpop.f32.mrf.mxu0 }
 0x139   :  { %v461_v7 = vpop.f32.mrf.mxu1  ;;  %v448_v8 = vadd.f32 %v447_v5, %v247_v6 }
 0x13b   :  { %v462_v13 = vadd.f32 %v461_v7, %v448_v8 }
 0x13d   :  { %v467_v18 = vmax.f32 %v462_v13, 0.0 }
 0x13e   :  { %v419_v9 = vpop.f32.mrf.mxu2 }
 0x13f   :  { %v433_v11 = vpop.f32.mrf.mxu3  ;;  %v420_v16 = vadd.f32 %v419_v9, %v246_v10 }
 0x140   :  { %v449_v12 = vpop.f32.mrf.mxu0 }
 0x141   :  { %v450_v14 = vadd.f32 %v449_v12, %v247_v6  ;;  %v463_v15 = vpop.f32.mrf.mxu1  ;;  %v434_v21 = vadd.f32 %v433_v11, %v420_v16 }
 0x143   :  { %v464_v17 = vadd.f32 %v463_v15, %v450_v14  ;;  %v466_v26 = vmax.f32 %v434_v21, 0.0 }
 0x145   :  { %v469_v19 = vmax.f32 %v464_v17, 0.0 }
 0x146   :  { %v421_v20 = vpop.f32.mrf.mxu2 }
 0x147   :  { %v471_v22 = vpack.c.bf16 %v469_v19, %v467_v18  ;;  %v422_v23 = vadd.f32 %v421_v20, %v246_v10  ;;  %v435_v24 = vpop.f32.mrf.mxu3 }
 0x149   :  { %v436_v25 = vadd.f32 %v435_v24, %v422_v23  ;;  %692 = vmatmul.bf16.vlgmr.msrb.gmra.mxu3 %v471_v22  ;;  %720 = vmatmul.bf16.vlgmr.msra.gmra.mxu1 %v471_v22 }
 0x14b   :  { %v468_v27 = vmax.f32 %v436_v25, 0.0 }
 0x14d   :  { %v470_v28 = vpack.c.bf16 %v468_v27, %v466_v26 }
 0x14f   :  { %678 = vmatmul.bf16.vlgmr.msrb.gmra.mxu2 %v470_v28  ;;  %706 = vmatmul.bf16.vlgmr.msra.gmra.mxu0 %v470_v28 }
 0x1c6   :  { %v721_v33 = vpop.f32.mrf.mxu1 }
 0x1cc   :  { %v707_v30 = vpop.f32.mrf.mxu0  ;;  %v693_v35 = vpop.f32.mrf.mxu3 }
 0x1cd   :  { %v708_v34 = vadd.f32 %v707_v30, %v507_v31 }
 0x1ce   :  { %v723_v45 = vpop.f32.mrf.mxu1 }
 0x1cf   :  { %v722_v38 = vadd.f32 %v721_v33, %v708_v34 }
 0x1d2   :  { %v679_v36 = vpop.f32.mrf.mxu2 }
 0x1d3   :  { %v680_v37 = vadd.f32 %v679_v36, %v506_v32 }
 0x1d4   :  { %v709_v40 = vpop.f32.mrf.mxu0  ;;  %v695_v46 = vpop.f32.mrf.mxu3 }
 0x1d5   :  { %v694_v39 = vadd.f32 %v693_v35, %v680_v37  ;;  %v710_v42 = vadd.f32 %v709_v40, %v507_v31 }
 0x1d7   :  { %v726_v41 = vpack.c.bf16 %v722_v38, %v694_v39  ;;  %v724_v47 = vadd.f32 %v723_v45, %v710_v42 }
 0x1d9   :  { %728 = vst [vmem:[%s1299_s7] sm:$0xff] %v726_v41 }
 0x1da   :  { %v681_v43 = vpop.f32.mrf.mxu2 }
 0x1db   :  { %v682_v44 = vadd.f32 %v681_v43, %v506_v32 }
 0x1dd   :  { %v696_v48 = vadd.f32 %v695_v46, %v682_v44 }
 0x1df   :  { %v727_v49 = vpack.c.bf16 %v724_v47, %v696_v48 }
 0x1e1   :  { %729 = vst [vmem:[%s1299_s7 + $0x8] sm:$0xff] %v727_v49 }
 0x1e2   :  { %734 = vsyncpa [#allocation3], 1 }
 0x1e3   :  { %735 = vsyncpa [#allocation5], 1 }

</bundles_post_ra>
